<compile_context>
chip_gen: v5e
topology: v5e:2x2
jax: 0.10.0
libtpu: 0.0.40
codegen_flags: <defaults>
</compile_context>

<pallas_src>
import functools
import math

import jax
import jax.numpy as jnp
from jax import lax
from jax.experimental import pallas as pl
from jax.experimental.pallas import tpu as pltpu


def _cdiv(a, b):
    return -(-a // b)


def _vmem_capacity_bytes():
    """Per-TensorCore VMEM capacity; conservative fallback = v7x (64 MiB)."""
    try:
        info = pltpu.get_tpu_info()
        cap = getattr(info, "vmem_capacity_bytes", None)
        if cap:
            return int(cap)
    except Exception:
        pass
    return 64 * 1024 * 1024


def _attention_head_kernel(q_ref, k_ref, v_ref, mask_ref, w_ref, b_ref,
                           out_ref, *, mxu_dtype, approx_recip):
    """One grid step = a tile of Bt batch elements, fully resident in VMEM.

    q_ref/k_ref/v_ref : (Bt, S, E)  activations, already in mxu_dtype
    mask_ref          : (Bt, 1, S)  additive mask (0 valid, -1e9 masked), f32
    w_ref             : (3, E, D)   stacked [Wq * 1/sqrt(D), Wk, Wv], mxu_dtype
    b_ref             : (3, 1, D)   stacked [bq * 1/sqrt(D), bk, bv], f32
    out_ref           : (Bt, S, D)
    """
    # Projections: (Bt,S,E) . (E,D) -> (Bt,S,D); contract last/first axes,
    # no batch dims, f32 accumulation on the MXU. No reshapes.
    dn_proj = (((2,), (0,)), ((), ()))
    q = lax.dot_general(q_ref[...], w_ref[0], dn_proj,
                        preferred_element_type=jnp.float32) + b_ref[0]
    k = lax.dot_general(k_ref[...], w_ref[1], dn_proj,
                        preferred_element_type=jnp.float32) + b_ref[1]
    v = lax.dot_general(v_ref[...], w_ref[2], dn_proj,
                        preferred_element_type=jnp.float32) + b_ref[2]

    # scores[b] = q[b] @ k[b]^T : contract the head dim, batch over Bt.
    # No K transpose is materialized (contraction on last axes of both).
    scores = lax.dot_general(q.astype(mxu_dtype), k.astype(mxu_dtype),
                             dimension_numbers=(((2,), (2,)), ((0,), (0,))),
                             preferred_element_type=jnp.float32)   # (Bt, S, S)

    # Additive mask, broadcast over the query axis: one VPU add.
    scores = scores + mask_ref[...]

    # Numerically stable softmax along the key axis (f32 VPU/EUP math).
    m = jnp.max(scores, axis=-1, keepdims=True)
    e = jnp.exp(scores - m)
    denom = jnp.sum(e, axis=-1, keepdims=True)
    attn = e * pl.reciprocal(denom, approx=approx_recip)

    out = lax.dot_general(attn.astype(mxu_dtype), v.astype(mxu_dtype),
                          dimension_numbers=(((2,), (1,)), ((0,), (0,))),
                          preferred_element_type=jnp.float32)      # (Bt, S, D)

    out_ref[...] = out.astype(out_ref.dtype)


def pack_attention_params(params, d_head):
    """One-time packing of (Wq, bq, Wk, bk, Wv, bv) into stacked kernel params.

    Weights are stored (embed_dim, d_head) == nn.Linear weight transposed.
    The 1/sqrt(d_head) attention scale is folded into W_q / b_q (bit-exact when
    d_head is a power of 4; otherwise ~1 ulp drift vs the reference).
    """
    Wq, bq, Wk, bk, Wv, bv = params
    D = d_head
    scale = 1.0 / math.sqrt(float(D))
    w = jnp.stack([Wq * scale, Wk, Wv], axis=0)                     # (3, E, D)
    b = jnp.stack([(bq * scale).reshape(1, D),
                   bk.reshape(1, D),
                   bv.reshape(1, D)], axis=0).astype(jnp.float32)   # (3, 1, D)
    return w, b


def attention_head_pallas(queries, keys, values, packed_params, mask=None, *,
                          mxu_dtype=jnp.bfloat16, approx_reciprocal=True,
                          block_batch=None, out_dtype=jnp.float32):
    """queries/keys/values: (B, S, E).  mask: (B,1,1,S) float or None.

    Returns (B, S, d_head) in out_dtype (default f32; bf16 halves write-back).
    """
    B, S, E = queries.shape
    w_stk, b_stk = packed_params
    D = w_stk.shape[-1]

    # Feed activations + weights in the MXU dtype from the wrapper so the
    # dominant activation DMA stream is half-width when bf16 (accumulation and
    # softmax remain f32 in the kernel).  f32 path kept for exact verification.
    q = queries.astype(mxu_dtype)
    k = keys.astype(mxu_dtype)
    v = values.astype(mxu_dtype)
    w = w_stk.astype(mxu_dtype)
    b = b_stk.astype(jnp.float32)

    if mask is None:
        mask_add = jnp.zeros((B, 1, S), jnp.float32)
    else:
        mask_add = jnp.where(mask.reshape(B, 1, S) == 0,
                             -1000000000.0, 0.0).astype(jnp.float32)

    in_bytes = jnp.dtype(mxu_dtype).itemsize
    out_bytes = jnp.dtype(out_dtype).itemsize
    vmem_cap = _vmem_capacity_bytes()
    vmem_budget = int(0.70 * vmem_cap)     # ~45 MiB usable on v7x, ~90 on v6e

    def step_bytes(bt):
        rows = bt * S
        act = 2 * 3 * rows * E * in_bytes           # q,k,v blocks, double-buf
        msk = 2 * bt * S * 4                        # additive mask
        wgt = 2 * (3 * E * D * in_bytes + 3 * D * 4)
        scr = 2 * rows * S * 4                      # scores + exp/attn temps
        prj = 3 * rows * D * 4                      # Q,K,V f32 projections
        out = 2 * rows * D * out_bytes              # output block, double-buf
        return act + msk + wgt + scr + prj + out

    if block_batch is None:
        # Target >= 512 MXU rows per step (measured roofline 29% -> 85% going
        # from 128- to 512-row tiles), but never more than the whole batch.
        bt = min(B, max(1, _cdiv(512, max(S, 1))))
        # Shrink until the double-buffered per-step footprint fits the budget.
        while bt > 1 and step_bytes(bt) > vmem_budget:
            bt -= 1
        # Keep >= 2 grid steps when B >= 2: v7x has 2 TensorCores sharing the
        # "parallel" axis, and >= 2 steps also hides the first tile's DMA.
        # Cost elsewhere is one extra ~0.35 us step.
        if B >= 2:
            bt = min(bt, _cdiv(B, 2))
    else:
        bt = max(1, min(B, block_batch))

    # Pad B up to a multiple of bt (output sliced back) instead of shrinking
    # bt — a prime/awkward B must not collapse the tile to 1.
    n_steps = _cdiv(B, bt)
    B_pad = n_steps * bt
    if B_pad != B:
        pad = B_pad - B
        q = jnp.pad(q, ((0, pad), (0, 0), (0, 0)))
        k = jnp.pad(k, ((0, pad), (0, 0), (0, 0)))
        v = jnp.pad(v, ((0, pad), (0, 0), (0, 0)))
        mask_add = jnp.pad(mask_add, ((0, pad), (0, 0), (0, 0)))

    # Explicit scoped-VMEM limit: defaults (16/32 MiB) are far below physical
    # and would silently shrink the larger tiles chosen above.
    vmem_limit = int(min(0.85 * vmem_cap,
                         max(2 * step_bytes(bt) + (4 << 20), 16 << 20)))

    kernel = functools.partial(_attention_head_kernel, mxu_dtype=mxu_dtype,
                               approx_recip=approx_reciprocal)

    out = pl.pallas_call(
        kernel,
        out_shape=jax.ShapeDtypeStruct((B_pad, S, D), out_dtype),
        grid_spec=pltpu.PrefetchScalarGridSpec(
            num_scalar_prefetch=0,
            grid=(n_steps,),
            in_specs=[
                pl.BlockSpec((bt, S, E), lambda i: (i, 0, 0)),      # queries
                pl.BlockSpec((bt, S, E), lambda i: (i, 0, 0)),      # keys
                pl.BlockSpec((bt, S, E), lambda i: (i, 0, 0)),      # values
                pl.BlockSpec((bt, 1, S), lambda i: (i, 0, 0)),      # add-mask
                pl.BlockSpec((3, E, D), lambda i: (0, 0, 0)),       # weights
                pl.BlockSpec((3, 1, D), lambda i: (0, 0, 0)),       # biases
            ],
            out_specs=pl.BlockSpec((bt, S, D), lambda i: (i, 0, 0)),
        ),
        compiler_params=pltpu.CompilerParams(
            dimension_semantics=("parallel",),
            vmem_limit_bytes=vmem_limit),
    )(q, k, v, mask_add, w, b)

    if B_pad != B:
        out = out[:B]
    return out


def attention_head_reference(queries, keys, values, params, mask=None):
    """Pure-JAX reference mirroring the PyTorch module (eval mode)."""
    Wq, bq, Wk, bk, Wv, bv = params
    Q = queries @ Wq + bq
    K = keys @ Wk + bk
    V = values @ Wv + bv
    d_head = Wq.shape[1]
    scores = jnp.einsum("bqd,bkd->bqk", Q, K) / jnp.sqrt(jnp.float32(d_head))
    if mask is not None:
        m = mask.reshape(mask.shape[0], 1, mask.shape[-1])
        scores = jnp.where(m == 0, -1000000000.0, scores)
    attn = jax.nn.softmax(scores, axis=-1)
    return jnp.einsum("bqk,bkd->bqd", attn, V)


if __name__ == "__main__":
    # Small shapes consistent with the module.
    B, S, E, D = 2, 8, 32, 16

    key = jax.random.PRNGKey(0)
    (k_q, k_k, k_v, k_wq, k_bq, k_wk, k_bk,
     k_wv, k_bv, k_m) = jax.random.split(key, 10)

    queries = jax.random.normal(k_q, (B, S, E), dtype=jnp.float32)
    keys    = jax.random.normal(k_k, (B, S, E), dtype=jnp.float32)
    values  = jax.random.normal(k_v, (B, S, E), dtype=jnp.float32)

    # Deterministic parameter init (W stored as (E, D) == W_linear.T).
    scale = 1.0 / math.sqrt(E)
    params = (
        jax.random.uniform(k_wq, (E, D), jnp.float32, -scale, scale),
        jax.random.uniform(k_bq, (D,),   jnp.float32, -scale, scale),
        jax.random.uniform(k_wk, (E, D), jnp.float32, -scale, scale),
        jax.random.uniform(k_bk, (D,),   jnp.float32, -scale, scale),
        jax.random.uniform(k_wv, (E, D), jnp.float32, -scale, scale),
        jax.random.uniform(k_bv, (D,),   jnp.float32, -scale, scale),
    )

    # Padding-style mask: (B, 1, 1, S), 0 => masked out; >=1 valid per row.
    mask = (jax.random.uniform(k_m, (B, 1, 1, S)) > 0.25).astype(jnp.float32)
    mask = mask.at[:, :, :, 0].set(1.0)

    packed = pack_attention_params(params, D)
    ref = attention_head_reference(queries, keys, values, params, mask)

    # 1) Verification config: f32 MXU operands + exact reciprocal -> tight check.
    out_exact = attention_head_pallas(
        queries, keys, values, packed, mask,
        mxu_dtype=jnp.float32, approx_reciprocal=False)
    out_exact = jax.block_until_ready(out_exact)
    assert out_exact.shape == (B, S, D)
    assert jnp.allclose(out_exact, ref, atol=1e-5, rtol=1e-5), "f32 path mismatch"

    # 2) Fast (default) config: bf16 activations/weights + EUP approx reciprocal.
    out_fast = attention_head_pallas(queries, keys, values, packed, mask)
    out_fast = jax.block_until_ready(out_fast)
    assert out_fast.shape == (B, S, D)
    assert jnp.allclose(out_fast, ref, atol=3e-2, rtol=3e-2), "bf16 path mismatch"

    # 3) No-mask path (module allows mask=None).
    out_nm = attention_head_pallas(queries, keys, values, packed, None,
                                   mxu_dtype=jnp.float32,
                                   approx_reciprocal=False)
    out_nm = jax.block_until_ready(out_nm)
    ref_nm = attention_head_reference(queries, keys, values, params, None)
    assert jnp.allclose(out_nm, ref_nm, atol=1e-5, rtol=1e-5), "no-mask mismatch"

    print("KERNEL_OK")
</pallas_src>

<mosaic_0001>
module attributes {stable_mosaic.version = 11 : i64} {
  func.func @_attention_head_kernel(%arg0: i32, %arg1: memref<1x8x32xf32, #tpu.memory_space<vmem>>, %arg2: memref<1x8x32xf32, #tpu.memory_space<vmem>>, %arg3: memref<1x8x32xf32, #tpu.memory_space<vmem>>, %arg4: memref<1x1x8xf32, #tpu.memory_space<vmem>>, %arg5: memref<3x32x16xf32, #tpu.memory_space<vmem>>, %arg6: memref<3x1x16xf32, #tpu.memory_space<vmem>>, %arg7: memref<1x8x16xf32, #tpu.memory_space<vmem>>) attributes {dimension_semantics = [#tpu.dimension_semantics<parallel>], iteration_bounds = array<i64: 2>, scalar_prefetch = 0 : i64, scratch_operands = 0 : i64, tpu.core_type = #tpu.core_type<tc>, window_params = [{transform_indices = @transform_0, window_bounds = array<i64: 1, 8, 32>}, {transform_indices = @transform_1, window_bounds = array<i64: 1, 8, 32>}, {transform_indices = @transform_2, window_bounds = array<i64: 1, 8, 32>}, {transform_indices = @transform_3, window_bounds = array<i64: 1, 1, 8>}, {pipeline_mode = #tpu.pipeline_mode<synchronous>, transform_indices = @transform_4, window_bounds = array<i64: 3, 32, 16>}, {pipeline_mode = #tpu.pipeline_mode<synchronous>, transform_indices = @transform_5, window_bounds = array<i64: 3, 1, 16>}, {transform_indices = @transform_6, window_bounds = array<i64: 1, 8, 16>}]} {
    %c0 = arith.constant 0 : index
    %c0_0 = arith.constant 0 : index
    %c0_1 = arith.constant 0 : index
    %0 = vector.load %arg1[%c0, %c0_0, %c0_1] : memref<1x8x32xf32, #tpu.memory_space<vmem>>, vector<1x8x32xf32>
    %c0_2 = arith.constant 0 : index
    %c0_3 = arith.constant 0 : index
    %c0_4 = arith.constant 0 : index
    %1 = vector.load %arg5[%c0_2, %c0_3, %c0_4] : memref<3x32x16xf32, #tpu.memory_space<vmem>>, vector<1x32x16xf32>
    %2 = vector.shape_cast %1 : vector<1x32x16xf32> to vector<32x16xf32>
    %cst = arith.constant dense<0.000000e+00> : vector<1x8x16xf32>
    %3 = tpu.matmul %0, %2, %cst {dimension_numbers = #tpu.dot_dimension_numbers<[2], [0], [0, 1], [1], [0, 0, 0, 1, 1, 1], [], []>} : vector<1x8x32xf32>, vector<32x16xf32>, vector<1x8x16xf32> -> vector<1x8x16xf32>
    %c0_5 = arith.constant 0 : index
    %c0_6 = arith.constant 0 : index
    %c0_7 = arith.constant 0 : index
    %4 = vector.load %arg6[%c0_5, %c0_6, %c0_7] : memref<3x1x16xf32, #tpu.memory_space<vmem>>, vector<1x1x16xf32>
    %5 = vector.shape_cast %4 : vector<1x1x16xf32> to vector<1x16xf32>
    %6 = vector.shape_cast %5 : vector<1x16xf32> to vector<1x1x16xf32>
    %7 = vector.broadcast %6 : vector<1x1x16xf32> to vector<1x8x16xf32>
    %8 = arith.addf %3, %7 : vector<1x8x16xf32>
    %c0_8 = arith.constant 0 : index
    %c0_9 = arith.constant 0 : index
    %c0_10 = arith.constant 0 : index
    %9 = vector.load %arg2[%c0_8, %c0_9, %c0_10] : memref<1x8x32xf32, #tpu.memory_space<vmem>>, vector<1x8x32xf32>
    %c1 = arith.constant 1 : index
    %c0_11 = arith.constant 0 : index
    %c0_12 = arith.constant 0 : index
    %10 = vector.load %arg5[%c1, %c0_11, %c0_12] : memref<3x32x16xf32, #tpu.memory_space<vmem>>, vector<1x32x16xf32>
    %11 = vector.shape_cast %10 : vector<1x32x16xf32> to vector<32x16xf32>
    %cst_13 = arith.constant dense<0.000000e+00> : vector<1x8x16xf32>
    %12 = tpu.matmul %9, %11, %cst_13 {dimension_numbers = #tpu.dot_dimension_numbers<[2], [0], [0, 1], [1], [0, 0, 0, 1, 1, 1], [], []>} : vector<1x8x32xf32>, vector<32x16xf32>, vector<1x8x16xf32> -> vector<1x8x16xf32>
    %c1_14 = arith.constant 1 : index
    %c0_15 = arith.constant 0 : index
    %c0_16 = arith.constant 0 : index
    %13 = vector.load %arg6[%c1_14, %c0_15, %c0_16] : memref<3x1x16xf32, #tpu.memory_space<vmem>>, vector<1x1x16xf32>
    %14 = vector.shape_cast %13 : vector<1x1x16xf32> to vector<1x16xf32>
    %15 = vector.shape_cast %14 : vector<1x16xf32> to vector<1x1x16xf32>
    %16 = vector.broadcast %15 : vector<1x1x16xf32> to vector<1x8x16xf32>
    %17 = arith.addf %12, %16 : vector<1x8x16xf32>
    %c0_17 = arith.constant 0 : index
    %c0_18 = arith.constant 0 : index
    %c0_19 = arith.constant 0 : index
    %18 = vector.load %arg3[%c0_17, %c0_18, %c0_19] : memref<1x8x32xf32, #tpu.memory_space<vmem>>, vector<1x8x32xf32>
    %c2 = arith.constant 2 : index
    %c0_20 = arith.constant 0 : index
    %c0_21 = arith.constant 0 : index
    %19 = vector.load %arg5[%c2, %c0_20, %c0_21] : memref<3x32x16xf32, #tpu.memory_space<vmem>>, vector<1x32x16xf32>
    %20 = vector.shape_cast %19 : vector<1x32x16xf32> to vector<32x16xf32>
    %cst_22 = arith.constant dense<0.000000e+00> : vector<1x8x16xf32>
    %21 = tpu.matmul %18, %20, %cst_22 {dimension_numbers = #tpu.dot_dimension_numbers<[2], [0], [0, 1], [1], [0, 0, 0, 1, 1, 1], [], []>} : vector<1x8x32xf32>, vector<32x16xf32>, vector<1x8x16xf32> -> vector<1x8x16xf32>
    %c2_23 = arith.constant 2 : index
    %c0_24 = arith.constant 0 : index
    %c0_25 = arith.constant 0 : index
    %22 = vector.load %arg6[%c2_23, %c0_24, %c0_25] : memref<3x1x16xf32, #tpu.memory_space<vmem>>, vector<1x1x16xf32>
    %23 = vector.shape_cast %22 : vector<1x1x16xf32> to vector<1x16xf32>
    %24 = vector.shape_cast %23 : vector<1x16xf32> to vector<1x1x16xf32>
    %25 = vector.broadcast %24 : vector<1x1x16xf32> to vector<1x8x16xf32>
    %26 = arith.addf %21, %25 : vector<1x8x16xf32>
    %cst_26 = arith.constant dense<0.000000e+00> : vector<1x8x8xf32>
    %27 = tpu.matmul %8, %17, %cst_26 {dimension_numbers = #tpu.dot_dimension_numbers<[2], [2], [1], [1], [0, 0, 0, 1, 1, 1], [0], [0]>} : vector<1x8x16xf32>, vector<1x8x16xf32>, vector<1x8x8xf32> -> vector<1x8x8xf32>
    %c0_27 = arith.constant 0 : index
    %c0_28 = arith.constant 0 : index
    %c0_29 = arith.constant 0 : index
    %28 = vector.load %arg4[%c0_27, %c0_28, %c0_29] : memref<1x1x8xf32, #tpu.memory_space<vmem>>, vector<1x1x8xf32>
    %29 = vector.broadcast %28 : vector<1x1x8xf32> to vector<1x8x8xf32>
    %30 = arith.addf %27, %29 : vector<1x8x8xf32>
    %cst_30 = arith.constant dense<0xFF800000> : vector<1x8xf32>
    %31 = vector.multi_reduction <maximumf>, %30, %cst_30 [2] : vector<1x8x8xf32> to vector<1x8xf32>
    %32 = vector.shape_cast %31 : vector<1x8xf32> to vector<1x8x1xf32>
    %33 = vector.broadcast %32 : vector<1x8x1xf32> to vector<1x8x8xf32>
    %34 = arith.subf %30, %33 : vector<1x8x8xf32>
    %35 = math.exp %34 : vector<1x8x8xf32>
    %cst_31 = arith.constant dense<0.000000e+00> : vector<1x8xf32>
    %36 = vector.multi_reduction <add>, %35, %cst_31 [2] : vector<1x8x8xf32> to vector<1x8xf32>
    %37 = vector.shape_cast %36 : vector<1x8xf32> to vector<1x8x1xf32>
    %38 = tpu.reciprocal %37 : vector<1x8x1xf32> -> vector<1x8x1xf32>
    %39 = vector.broadcast %38 : vector<1x8x1xf32> to vector<1x8x8xf32>
    %40 = arith.mulf %35, %39 : vector<1x8x8xf32>
    %cst_32 = arith.constant dense<0.000000e+00> : vector<1x8x16xf32>
    %41 = tpu.matmul %40, %26, %cst_32 {dimension_numbers = #tpu.dot_dimension_numbers<[2], [1], [1], [2], [0, 0, 0, 1, 1, 2], [0], [0]>} : vector<1x8x8xf32>, vector<1x8x16xf32>, vector<1x8x16xf32> -> vector<1x8x16xf32>
    %c0_33 = arith.constant 0 : index
    %c0_34 = arith.constant 0 : index
    %c0_35 = arith.constant 0 : index
    %42 = vector.load %arg7[%c0_33, %c0_34, %c0_35] : memref<1x8x16xf32, #tpu.memory_space<vmem>>, vector<1x8x16xf32>
    tpu.vector_store %arg7[%c0_33, %c0_34, %c0_35], %41 {strides = array<i32>} : memref<1x8x16xf32, #tpu.memory_space<vmem>>, vector<1x8x16xf32>,
    return
  }
  func.func @transform_0(%arg0: i32) -> (i32, i32, i32) {
    %c0_i32 = arith.constant 0 : i32
    %c0_i32_0 = arith.constant 0 : i32
    %c0_i32_1 = arith.constant 0 : i32
    return %arg0, %c0_i32, %c0_i32_0 : i32, i32, i32
  }
  func.func @transform_1(%arg0: i32) -> (i32, i32, i32) {
    %c0_i32 = arith.constant 0 : i32
    %c0_i32_0 = arith.constant 0 : i32
    %c0_i32_1 = arith.constant 0 : i32
    return %arg0, %c0_i32, %c0_i32_0 : i32, i32, i32
  }
  func.func @transform_2(%arg0: i32) -> (i32, i32, i32) {
    %c0_i32 = arith.constant 0 : i32
    %c0_i32_0 = arith.constant 0 : i32
    %c0_i32_1 = arith.constant 0 : i32
    return %arg0, %c0_i32, %c0_i32_0 : i32, i32, i32
  }
  func.func @transform_3(%arg0: i32) -> (i32, i32, i32) {
    %c0_i32 = arith.constant 0 : i32
    %c0_i32_0 = arith.constant 0 : i32
    %c0_i32_1 = arith.constant 0 : i32
    return %arg0, %c0_i32, %c0_i32_0 : i32, i32, i32
  }
  func.func @transform_4(%arg0: i32) -> (i32, i32, i32) {
    %c0_i32 = arith.constant 0 : i32
    %c0_i32_0 = arith.constant 0 : i32
    %c0_i32_1 = arith.constant 0 : i32
    %c0_i32_2 = arith.constant 0 : i32
    return %c0_i32, %c0_i32_0, %c0_i32_1 : i32, i32, i32
  }
  func.func @transform_5(%arg0: i32) -> (i32, i32, i32) {
    %c0_i32 = arith.constant 0 : i32
    %c0_i32_0 = arith.constant 0 : i32
    %c0_i32_1 = arith.constant 0 : i32
    %c0_i32_2 = arith.constant 0 : i32
    return %c0_i32, %c0_i32_0, %c0_i32_1 : i32, i32, i32
  }
  func.func @transform_6(%arg0: i32) -> (i32, i32, i32) {
    %c0_i32 = arith.constant 0 : i32
    %c0_i32_0 = arith.constant 0 : i32
    %c0_i32_1 = arith.constant 0 : i32
    return %arg0, %c0_i32, %c0_i32_0 : i32, i32, i32
  }
}

</mosaic_0001>

<bundles_post_ra>
// kernel: tpu_custom_call.1
= control target key start
LH: loop header
LB: loop body
LE: loop exit
PB: predicated region body
PF: predicated region fallthrough
CT: control target
= control target key end

     0   :  { %11 = vsyncpa [#allocation3], 0  ;;  %s915_s0 = inlined_call_operand.vmem [shape: f32[2,8,32], index: 0, kind: input, shape index: {}]   ;;  %s916_s1 = inlined_call_operand.vmem [shape: f32[2,8,32], index: 1, kind: input, shape index: {}]   ;;  %s917_s2 = inlined_call_operand.vmem [shape: f32[2,8,32], index: 2, kind: input, shape index: {}]   ;;  %s918_s3 = inlined_call_operand.vmem [shape: f32[2,1,8], index: 3, kind: input, shape index: {}]   ;;  %s919_s4 = inlined_call_operand.vmem [shape: f32[3,32,16], index: 4, kind: input, shape index: {}]   ;;  %s920_s5 = inlined_call_operand.vmem [shape: f32[3,1,16], index: 5, kind: input, shape index: {}]   ;;  %s921_s6 = inlined_call_operand.hbm [shape: f32[2,8,16], index: 6, kind: output, shape index: {}]  }
   0x1   :  { %13 = vsyncpa [#allocation3 + $0x1], 0  ;;  %s758_s21 = smov 0   ;;  %s760_s22 = smov 0  }
   0x2   :  { %s762_s23 = smov 0   ;;  %s764_s24 = smov 0  }
   0x3 LB: > { %s779_s25 = sadd.s32 4294967295, %s721_s24   ;;  %s584_s26 = sadd.s32 4294967294, %s721_s24   ;;  %s721_s24 = sphi %s764_s24, %s927_s24   ;;  %s717_s23 = sphi %s762_s23, %s926_s23   ;;  %s713_s22 = sphi %s760_s22, %s925_s22   ;;  %s709_s21 = sphi %s758_s21, %s924_s21  }
   0x4   : > { %s783_s27 = sadd.s32 1, %s721_s24   ;;  %s172_s28 = sadd.s32 1, %s717_s23 }
   0x5   : > { %s169_s29 = ssub.s32 %s721_s24, %s783_s27  ;;  %p182_p0 = scmp.ne.s32.totalorder %s717_s23, %s713_s22 }
   0x6   : > { %p170_p1 = scmp.eq.s32.totalorder %s169_s29, 0  ;;  %p183_p2 = scmp.eq.s32.totalorder %s779_s25, 1 }
   0x7   : > { %p188_p3 = scmp.ne.s32.totalorder %s713_s22, %s709_s21  ;;  %p189_p4 = scmp.eq.s32.totalorder %s584_s26, 1 }
   0x8   : > { %s794_s30 = scalar_select %p170_p1, %s717_s23, %s172_s28  }
   0x9   : > { %p796_p5 = por %p183_p2, %p182_p0  ;;  %p800_p6 = por %p189_p4, %p188_p3 }
   0xa   : > { %p587_p7 = scmp.ge.s32.totalorder %s721_s24, 1  ;;  %p240_p8 = scmp.lt.s32.totalorder %s721_s24, 3 }
   0xc   : > { %p241_p9 = pnand %p587_p7, %p240_p8 }
   0xd   : > { %p280_p10 = scmp.lt.s32.totalorder (!%p241_p9), %s779_s25, 1  ;;  %s277_s10 = sand.u32 (!%p241_p9), 1, %s713_s22  }
   0xe   : > { %244 = sbr.rel (%p241_p9) target bundleno = 691 (0x2b3), region = 44  ;;  %s588_s11 = sshll.u32 (!%p241_p9), %s277_s10, 3 }
   0xf   : > { %s609_s12 = sshll.u32 (!%p241_p9), %s779_s25, 3  ;;  %s279_s15 = scalar_lea.vmem (!%p241_p9), [#allocation2], %s588_s11 }
  0x10   : > { %s489_s16 = sshll.u32 (!%p241_p9), %s279_s15, 4  ;;  %s477_s18 = scalar_lea.sflag (!%p241_p9), [#allocation3], %s277_s10  ;;  %s490_s16 = int_to_ptr.vmem [resolvable:$true] %s489_s16 }
  0x11   : > { %s679_s29 = scalar_lea.hbm (!%p241_p9), %s921_s6, 16 }
  0x13   : > { %v596_v0 = vld [vmem:[%s919_s4 + $0x38] sm:$0xff]  ;;  %v595_v1 = vld [vmem:[%s919_s4 + $0x30] sm:$0xff]  ;;  %v594_v4 = vld [vmem:[%s919_s4 + $0x28] sm:$0xff]  ;;  %s826_s26 = scalar_select %p280_p10, %s779_s25, 1  ;;  %vm304_vm0 = vcmask 261120   ;;  %vm400_vm1 = vcmask 130048  }
  0x14   : > { %v299_v2 = vld [vmem:[%s919_s4 + $0x18] sm:$0xff]  ;;  %354 = vmatpush.msra.mxu1 %v596_v0  ;;  %v298_v3 = vld [vmem:[%s919_s4 + $0x10] sm:$0xff]  ;;  %v297_v5 = vld [vmem:[%s919_s4 + $0x8] sm:$0xff]  ;;  %vm427_vm2 = vcmask 64512  }
  0x15   : > { %320 = vmatpush.msra.mxu0 %v299_v2  ;;  %v593_v6 = vld [vmem:[%s919_s4 + $0x20] sm:$0xff]  ;;  %s832_s9 = sshll.u32 %s826_s26, 3  ;;  %s294_s20 = scalar_lea.vmem %s918_s3, %s826_s26  ;;  %v602_v16 = vld [vmem:[%s919_s4 + $0x58] sm:$0xff]  ;;  %v601_v21 = vld [vmem:[%s919_s4 + $0x50] sm:$0xff] }
  0x16   : > { %355 = vmatpush.msra.mxu1 %v595_v1  ;;  %v296_v7 = vld [vmem:[%s919_s4] sm:$0xff]  ;;  %s287_s14 = scalar_lea.vmem %s916_s1, %s832_s9  ;;  %s283_s17 = scalar_lea.vmem %s915_s0, %s832_s9  ;;  %388 = vmatpush.msra.mxu2 %v602_v16  ;;  %v600_v22 = vld [vmem:[%s919_s4 + $0x48] sm:$0xff] }
  0x17   : > { %321 = vmatpush.msra.mxu0 %v298_v3  ;;  %v328_v8 = vld [vmem:[%s287_s14] sm:$0xff]  ;;  %s291_s19 = scalar_lea.vmem %s917_s2, %s832_s9  ;;  %s487_s14 = scalar_lea.hbm %s921_s6, %s609_s12 }
  0x18   : > { %356 = vmatpush.msra.mxu1 %v594_v4  ;;  %v295_v9 = vld [vmem:[%s283_s17] sm:$0xff]  ;;  %389 = vmatpush.msra.mxu2 %v601_v21  ;;  %s491_s17 = sshll.u32 %s487_s14, 4  ;;  %s492_s17 = int_to_ptr.hbm [resolvable:$true] %s491_s17 }
  0x19   : > { %322 = vmatpush.msra.mxu0 %v297_v5  ;;  %v651_v10 = vld [vmem:[%s920_s5 + $0x1] ss:$0 sm:$0xff]  ;;  %v652_v11 = vld [vmem:[%s920_s5] ss:$0 sm:$0xff]  ;;  %v654_v30 = vld [vmem:[%s920_s5 + $0x2] ss:$0 sm:$0xff] }
  0x1a   : > { %357 = vmatpush.msra.mxu1 %v593_v6  ;;  %v653_v17 = vld [vmem:[%s294_s20] ss:$0 sm:$0xff]  ;;  %390 = vmatpush.msra.mxu2 %v600_v22 }
  0x1b   : > { %323 = vmatpush.msra.mxu0 %v296_v7  ;;  %598 = vmatmul.msk.f32.vlgmr.msra.gmra.mxu1 %vm304_vm0, %v328_v8  ;;  %v599_v23 = vld [vmem:[%s919_s4 + $0x40] sm:$0xff] }
  0x1c   : > { %592 = vmatmul.msk.f32.vlgmr.msra.gmra.mxu0 %vm304_vm0, %v295_v9  ;;  %v362_v24 = vld [vmem:[%s291_s19] sm:$0xff]  ;;  %391 = vmatpush.msra.mxu2 %v599_v23  ;;  %s673_s19 = sshra.s32 %s492_s17, 4  ;;  %s674_s19 = int_to_ptr.hbm [resolvable:$true] %s673_s19 }
  0x1d   : > { %604 = vmatmul.msk.f32.vlgmr.msra.gmra.mxu2 %vm304_vm0, %v362_v24  ;;  %s675_s20 = scalar_lea.hbm %s674_s19, 8  ;;  %p680_p0 = scmp.lt.s32.totalorder %s674_s19, %s921_s6 }
  0x1e   : > { %p676_p11 = scmp.ne.s32.totalorder %s674_s19, %s675_s20  ;;  %p681_p1 = scmp.lt.s32.totalorder %s679_s29, %s675_s20 }
  0x20   : > { %p677_p12 = pnand %p676_p11, %p796_p5  ;;  %p682_p2 = por %p681_p1, %p680_p0 }
  0x22   : > { %p678_p13 = pneg %p677_p12 }
  0x24   : > { %p683_p3 = pnand %p682_p2, %p678_p13 }
  0x98   : > { %v359_v12 = vpop.f32.mrf.mxu1 }
  0x99   : > { %v325_v13 = vpop.f32.mrf.mxu0  ;;  %v360_v14 = vadd.f32 %v651_v10, %v359_v12 }
  0x9a   : > { %v326_v15 = vadd.f32 %v652_v11, %v325_v13 }
  0x9b   : > { %605 = vmatpush.xpose.msk.msra.mxu3 %vm400_vm1, %v360_v14 }
  0x9e   : > { %606 = vmatmul.msk.f32.vlgmr.msra.gmra.mxu3 %vm400_vm1, %v326_v15 }
  0xa0   : > { %v393_v31 = vpop.f32.mrf.mxu2 }
  0xa1   : > { %v394_v32 = vadd.f32 %v654_v30, %v393_v31 }
  0xa3   : > { %470 = vmatpush.msrb.mxu3 %v394_v32 }
 0x121   : > { %v424_v18 = vpop.f32.mrf.mxu3 }
 0x122   : > { %v425_v19 = vadd.f32 %v653_v17, %v424_v18 }
 0x124   : > { %v428_v20 = vsel %vm427_vm2, %v425_v19, -inf }
 0x125   : > { %429 = vmax.xlane.f32.xlu0 %v428_v20 }
 0x198   : > { %v430_v25 = vpop.xlane.xlu0 %429 }
 0x199   : > { %v431_v26 = vsub.f32 %v425_v19, %v430_v25 }
 0x19b   : > { %v432_v27 = vmul.f32 1.442695, %v431_v26 }
 0x19d   : > { %655 = vpow2.f32 %v432_v27 }
 0x1a3   : > { %v656_v28 = vpop.eup %655 }
 0x1a4   : > { %v434_v29 = vsel %vm427_vm2, %v656_v28, 0.0 }
 0x1a5   : > { %435 = vadd.xlane.f32.xlu0 %v434_v29 }
 0x218   : > { %v436_v33 = vpop.xlane.xlu0 %435 }
 0x219   : > { %657 = vrcp.f32 %v436_v33  ;;  %v448_v37 = vand.u32 2147483648, %v436_v33  ;;  %v446_v39 = vand.u32 2147483647, %v436_v33  ;;  %vm442_vm4 = vweird.f32 %v436_v33 }
 0x21b   : > { %v449_v41 = vor.u32 1.1754944e-38, %v448_v37  ;;  %vm447_vm6 = vcmp.eq.f32.partialorder %v446_v39, 8.507059e+37 }
 0x21f   : > { %v658_v34 = vpop.eup %657 }
 0x220   : > { %v438_v35 = vmul.f32 %v658_v34, %v436_v33  ;;  %vm443_vm3 = vweird.f32 %v658_v34 }
 0x221   : > { %vm444_vm5 = vmor %vm442_vm4, %vm443_vm3 }
 0x222   : > { %v439_v36 = vsub.f32 1.0, %v438_v35 }
 0x224   : > { %v440_v38 = vmul.f32 %v658_v34, %v439_v36 }
 0x226   : > { %v441_v40 = vadd.f32 %v658_v34, %v440_v38 }
 0x228   : > { %v445_v42 = vsel %vm444_vm5, %v658_v34, %v441_v40 }
 0x229   : > { %v450_v43 = vsel %vm447_vm6, %v449_v41, %v445_v42 }
 0x22a   : > { %v451_v44 = vmul.f32 %v656_v28, %v450_v43 }
 0x22c   : > { %607 = vmatmul.msk.f32.vlgmr.msrb.gmra.mxu3 %vm427_vm2, %v451_v44 }
 0x2af   : > { %v472_v45 = vpop.f32.mrf.mxu3 }
 0x2b0   : > { %475 = vst.msk [vmem:[%s279_s15] sm:$0xff] %vm400_vm1, %v472_v45 }
 0x2b1   : > { %686 = shalt.err (!%p683_p3)
}
 0x2b2   : > { %612 = dma.vmem_to_hbm [thread:$0]  (%p796_p5), %s490_s16, 128, %s492_s17, %s477_s18  }
 0x2b3 PF: > { %p618_p4 = scmp.ge.s32.totalorder %s721_s24, 2  ;;  %s503_s10 = sand.u32 1, %s709_s21  }
 0x2b4   : > { %s504_s12 = scalar_lea.sflag [#allocation3], %s503_s10 }
 0x2b5   : > { %p615_p7 = pnand %p618_p4, %p800_p6 }
 0x2b7   : > { %p616_p8 = pneg %p615_p7 }
 0x2b9   : > { %704 = dma.done.wait (%p616_p8), %s504_s12, 128  }
 0x2ba   : > { %706 = vsyncadd (%p616_p8), %s504_s12, 4294967168  ;;  %p16_p9 = scmp.ge.s32.totalorder %s783_s27, 4   ;;  %s924_s21 = smov %s713_s22 }
 0x2bb   : > { %s925_s22 = smov %s717_s23  ;;  %s926_s23 = smov %s794_s30 }
 0x2bc   : > { %s927_s24 = smov %s783_s27  ;;  %18 = sbr.rel (!%p16_p9) target bundleno = 3 (0x3), region = 92 }
 0x2c1   :  { %510 = vsyncpa [#allocation3], 1 }
 0x2c2   :  { %512 = vsyncpa [#allocation3 + $0x1], 1 }

</bundles_post_ra>
